<compile_context>
chip_gen: v7x
topology: tpu7x:2x2x1
jax: 0.10.0
libtpu: 0.0.40
codegen_flags: <defaults>
</compile_context>

<pallas_src>
import jax
import jax.numpy as jnp
from jax.experimental import pallas as pl
from jax.experimental.pallas import tpu as pltpu


F_IN = 58    # input feature dim (torch: GraphConvolution(58, 32))
F_PAD = 64   # row-padded slot for the fused [W1 | Wskip] weight inside the slab
H1 = 32      # graph-conv hidden dim
HR = 64      # readout / MLP hidden dim
W_ROWS = F_PAD + H1 + 2 * HR + 8   # 232 rows in the packed weight slab


def gcn_kernel(x_ref, adj_ref, w_ref, b_ref, out_ref):
    Gb, N, _ = x_ref.shape
    x = x_ref[...]            # (Gb, N, 58)  bf16
    adj = adj_ref[...]        # (Gb, N, N)   bf16

    # ---- packed parameter slabs (fetched once; constant block index) ----
    w = w_ref[...]                                   # (232, 64) bf16
    w_cat = w[0:F_IN, :]                             # (58, 64) = [W1 | Wskip]
    w_r = w[F_PAD:F_PAD + H1, :]                     # (32, 64)
    w_n1 = w[F_PAD + H1:F_PAD + H1 + HR, :]          # (64, 64)
    w_n2 = w[F_PAD + H1 + HR:F_PAD + H1 + 2 * HR, :]  # (64, 64)
    w_n3 = w[F_PAD + H1 + 2 * HR:F_PAD + H1 + 2 * HR + 1, :]   # (1, 64) = Wn3^T

    b = b_ref[...]            # (8, 64) f32
    b1 = b[0:1, 0:H1]
    b2 = b[1:2, 0:H1]
    b3 = b[2:3, 0:H1]
    b_r = b[3:4, :]
    bn1 = b[4:5, :]
    bn2 = b[5:6, :]
    bn3 = b[6:7, 0:1]

    # ---- gc1: fused support/skip matmul over all nodes of the step ----
    x2 = x.reshape(Gb * N, F_IN)
    sup_skip = jnp.dot(x2, w_cat, preferred_element_type=jnp.float32)   # (Gb*N, 64)
    support = sup_skip[:, 0:H1].reshape(Gb, N, H1)                      # x @ W1
    skip = sup_skip[:, H1:2 * H1].reshape(Gb, N, H1)                    # Linear_skip(x)
    agg = jnp.einsum('bij,bjk->bik', adj, support.astype(jnp.bfloat16),
                     preferred_element_type=jnp.float32)                # per-graph adj @ support
    h = jnp.maximum(agg + skip + b1, 0.0)                               # (Gb, N, 32) f32

    # ---- gc2 / gc3: torch get_skip_connection with equal dims returns X + X,
    #      discarding the adj @ (X @ W) result (exact PyTorch-as-written semantics) ----
    h = jnp.maximum(2.0 * h + b2, 0.0)
    h = jnp.maximum(2.0 * h + b3, 0.0)

    # ---- readout: relu(h @ Wr + br), per-graph node sum, sigmoid ----
    h2 = h.astype(jnp.bfloat16).reshape(Gb * N, H1)
    z = jnp.maximum(jnp.dot(h2, w_r, preferred_element_type=jnp.float32) + b_r, 0.0)
    pooled = jnp.sum(z.reshape(Gb, N, HR), axis=1)                      # (Gb, 64)
    zs = jax.nn.sigmoid(pooled)

    # ---- MLP head ----
    zh = jnp.maximum(
        jnp.dot(zs.astype(jnp.bfloat16), w_n1, preferred_element_type=jnp.float32) + bn1, 0.0)
    zh = jnp.maximum(
        jnp.dot(zh.astype(jnp.bfloat16), w_n2, preferred_element_type=jnp.float32) + bn2, 0.0)
    y = jnp.sum(zh * w_n3.astype(jnp.float32), axis=-1, keepdims=True) + bn3   # (Gb, 1)
    out_ref[...] = y.reshape(Gb, 1, 1)


def gcn_forward(x, adj, w_slab, b_slab, *, graphs_per_step=None):
    B, N, F_in = x.shape
    assert F_in == F_IN
    assert adj.shape == (B, N, N)

    if graphs_per_step is None:
        # Target >= 128 MXU LHS sublane rows per step; round down to a divisor of B.
        gb = min(B, max(1, pl.cdiv(128, N)))
        while B % gb:
            gb -= 1
        graphs_per_step = gb
    Gb = graphs_per_step
    assert B % Gb == 0, "graphs_per_step must divide the batch"

    # bf16 inputs: MXU-native and halves HBM->VMEM DMA bytes for x / adj.
    x_bf = x.astype(jnp.bfloat16)
    adj_bf = adj.astype(jnp.bfloat16)

    flops = 2 * (B * N * F_IN * 2 * H1     # x @ [W1 | Wskip]
                 + B * N * N * H1          # per-graph adjacency aggregation
                 + B * N * H1 * HR         # readout matmul
                 + 2 * B * HR * HR         # nn1, nn2
                 + B * HR)                 # nn3 row product
    bytes_accessed = (x_bf.size * 2 + adj_bf.size * 2
                      + w_slab.size * 2 + b_slab.size * 4 + B * 4)

    out = pl.pallas_call(
        gcn_kernel,
        out_shape=jax.ShapeDtypeStruct((B, 1, 1), jnp.float32),
        grid=(B // Gb,),
        in_specs=[
            pl.BlockSpec((Gb, N, F_IN), lambda b: (b, 0, 0)),
            pl.BlockSpec((Gb, N, N), lambda b: (b, 0, 0)),
            pl.BlockSpec((W_ROWS, HR), lambda b: (0, 0)),
            pl.BlockSpec((8, HR), lambda b: (0, 0)),
        ],
        out_specs=pl.BlockSpec((Gb, 1, 1), lambda b: (b, 0, 0)),
        # Per-step VMEM is a few hundred KiB (independent of B), so the scoped-VMEM
        # defaults on v5e/v6e/v7x are fine; the parallel batch axis shards steps
        # across both TensorCores on v7x.
        compiler_params=pltpu.CompilerParams(dimension_semantics=("parallel",)),
        cost_estimate=pl.CostEstimate(flops=flops, transcendentals=B * HR,
                                      bytes_accessed=bytes_accessed),
    )(x_bf, adj_bf, w_slab, b_slab)
    return out.reshape(B, 1)


def pack_params(params):
    (w1, b1, wskip, b2, b3, wr, br, wn1, bn1, wn2, bn2, wn3, bn3) = params

    # Weight slab (232, 64), bf16:
    #   rows [  0: 64]  [W1 | Wskip] (58 real rows, 6 zero-pad rows)
    #   rows [ 64: 96]  Wr (32, 64)
    #   rows [ 96:160]  Wn1 ; [160:224] Wn2 ; [224:225] Wn3^T (1, 64) ; rest zero
    w_cat = jnp.pad(jnp.concatenate([w1, wskip], axis=1), ((0, F_PAD - F_IN), (0, 0)))
    w_n3r = jnp.pad(wn3.T, ((0, 7), (0, 0)))
    w_slab = jnp.concatenate([w_cat, wr, wn1, wn2, w_n3r], axis=0).astype(jnp.bfloat16)

    # Bias slab (8, 64), f32: rows = b1, b2, b3, br, bn1, bn2, bn3, zero-pad row.
    def pad_b(bv):
        bv = bv.reshape(1, -1)
        return jnp.pad(bv, ((0, 0), (0, HR - bv.shape[1])))

    b_slab = jnp.concatenate(
        [pad_b(b1), pad_b(b2), pad_b(b3), pad_b(br),
         pad_b(bn1), pad_b(bn2), pad_b(bn3), jnp.zeros((1, HR), jnp.float32)],
        axis=0).astype(jnp.float32)
    return w_slab, b_slab


def xavier_uniform(key, shape):
    fan_in, fan_out = shape
    limit = (6.0 / (fan_in + fan_out)) ** 0.5
    return jax.random.uniform(key, shape, jnp.float32, -limit, limit)


def init_params(key):
    ks = jax.random.split(key, 8)
    w1 = xavier_uniform(ks[0], (F_IN, H1))
    b1 = jnp.zeros((1, H1), jnp.float32)
    # TODO(synk): torch creates nn.Linear(58, 32) *fresh inside forward* (random each
    # call); here it is a single deterministic parameter instead.
    wskip = xavier_uniform(ks[1], (F_IN, H1))
    b2 = jnp.zeros((1, H1), jnp.float32)
    b3 = jnp.zeros((1, H1), jnp.float32)
    wr = xavier_uniform(ks[2], (H1, HR))
    br = jnp.zeros((1, HR), jnp.float32)
    wn1 = xavier_uniform(ks[3], (HR, HR))
    bn1 = jax.random.uniform(ks[4], (1, HR), jnp.float32, -0.125, 0.125)
    wn2 = xavier_uniform(ks[5], (HR, HR))
    bn2 = jax.random.uniform(ks[6], (1, HR), jnp.float32, -0.125, 0.125)
    wn3 = xavier_uniform(ks[7], (HR, 1))
    bn3 = jnp.zeros((1, 1), jnp.float32)
    return (w1, b1, wskip, b2, b3, wr, br, wn1, bn1, wn2, bn2, wn3, bn3)


def gcn_reference(x, adj, params):
    """Pure-JAX reference with the same bf16-matmul / f32-accumulate recipe."""
    (w1, b1, wskip, b2, b3, wr, br, wn1, bn1, wn2, bn2, wn3, bn3) = params
    bf = lambda a: a.astype(jnp.bfloat16)
    mm = lambda a, w: jnp.dot(bf(a), bf(w), preferred_element_type=jnp.float32)

    B, N, _ = x.shape
    x2 = x.reshape(B * N, F_IN)
    support = mm(x2, w1).reshape(B, N, H1)
    skip = mm(x2, wskip).reshape(B, N, H1)
    agg = jnp.einsum('bij,bjk->bik', bf(adj), bf(support),
                     preferred_element_type=jnp.float32)
    h = jnp.maximum(agg + skip + b1, 0.0)
    h = jnp.maximum(2.0 * h + b2, 0.0)
    h = jnp.maximum(2.0 * h + b3, 0.0)
    z = jnp.maximum(mm(h.reshape(B * N, H1), wr) + br, 0.0)
    zs = jax.nn.sigmoid(jnp.sum(z.reshape(B, N, HR), axis=1))
    zh = jnp.maximum(mm(zs, wn1) + bn1, 0.0)
    zh = jnp.maximum(mm(zh, wn2) + bn2, 0.0)
    y = jnp.sum(zh * bf(wn3).astype(jnp.float32).reshape(1, HR),
                axis=-1, keepdims=True) + bn3
    return y


if __name__ == "__main__":
    key = jax.random.PRNGKey(0)
    k_x, k_adj, k_p = jax.random.split(key, 3)

    B, N = 4, 16                                   # batch of 4 graphs, 16 nodes, 58 features
    x = jax.random.normal(k_x, (B, N, F_IN), jnp.float32)
    adj_raw = jax.random.uniform(k_adj, (B, N, N), jnp.float32)
    adj = adj_raw / jnp.sum(adj_raw, axis=-1, keepdims=True)   # row-normalized adjacency

    params = init_params(k_p)
    w_slab, b_slab = pack_params(params)           # pack once, reuse every forward

    out = gcn_forward(x, adj, w_slab, b_slab, graphs_per_step=2)   # 2-step parallel grid
    jax.block_until_ready(out)
    assert out.shape == (B, 1)

    ref = gcn_reference(x, adj, params)
    assert jnp.allclose(out, ref, atol=2e-2, rtol=2e-2), float(jnp.max(jnp.abs(out - ref)))
    print("KERNEL_OK")
</pallas_src>

<mosaic_0001>
module attributes {stable_mosaic.version = 11 : i64} {
  func.func @gcn_kernel(%arg0: i32, %arg1: memref<2x16x58xbf16, #tpu.memory_space<vmem>>, %arg2: memref<2x16x16xbf16, #tpu.memory_space<vmem>>, %arg3: memref<232x64xbf16, #tpu.memory_space<vmem>>, %arg4: memref<8x64xf32, #tpu.memory_space<vmem>>, %arg5: memref<2x1x1xf32, #tpu.memory_space<vmem>>) attributes {dimension_semantics = [#tpu.dimension_semantics<parallel>], iteration_bounds = array<i64: 2>, scalar_prefetch = 0 : i64, scratch_operands = 0 : i64, tpu.core_type = #tpu.core_type<tc>, window_params = [{transform_indices = @transform_0, window_bounds = array<i64: 2, 16, 58>}, {transform_indices = @transform_1, window_bounds = array<i64: 2, 16, 16>}, {pipeline_mode = #tpu.pipeline_mode<synchronous>, transform_indices = @transform_2, window_bounds = array<i64: 232, 64>}, {pipeline_mode = #tpu.pipeline_mode<synchronous>, transform_indices = @transform_3, window_bounds = array<i64: 8, 64>}, {transform_indices = @transform_4, window_bounds = array<i64: 2, 1, 1>}]} {
    %c0 = arith.constant 0 : index
    %c0_0 = arith.constant 0 : index
    %c0_1 = arith.constant 0 : index
    %0 = vector.load %arg1[%c0, %c0_0, %c0_1] : memref<2x16x58xbf16, #tpu.memory_space<vmem>>, vector<2x16x58xbf16>
    %c0_2 = arith.constant 0 : index
    %c0_3 = arith.constant 0 : index
    %c0_4 = arith.constant 0 : index
    %1 = vector.load %arg2[%c0_2, %c0_3, %c0_4] : memref<2x16x16xbf16, #tpu.memory_space<vmem>>, vector<2x16x16xbf16>
    %c0_5 = arith.constant 0 : index
    %c0_6 = arith.constant 0 : index
    %2 = vector.load %arg3[%c0_5, %c0_6] : memref<232x64xbf16, #tpu.memory_space<vmem>>, vector<232x64xbf16>
    %3 = vector.extract_strided_slice %2 {offsets = [0, 0], sizes = [58, 64], strides = [1, 1]} : vector<232x64xbf16> to vector<58x64xbf16>
    %4 = vector.extract_strided_slice %2 {offsets = [64, 0], sizes = [32, 64], strides = [1, 1]} : vector<232x64xbf16> to vector<32x64xbf16>
    %5 = vector.extract_strided_slice %2 {offsets = [96, 0], sizes = [64, 64], strides = [1, 1]} : vector<232x64xbf16> to vector<64x64xbf16>
    %6 = vector.extract_strided_slice %2 {offsets = [160, 0], sizes = [64, 64], strides = [1, 1]} : vector<232x64xbf16> to vector<64x64xbf16>
    %7 = vector.extract_strided_slice %2 {offsets = [224, 0], sizes = [1, 64], strides = [1, 1]} : vector<232x64xbf16> to vector<1x64xbf16>
    %c0_7 = arith.constant 0 : index
    %c0_8 = arith.constant 0 : index
    %8 = vector.load %arg4[%c0_7, %c0_8] : memref<8x64xf32, #tpu.memory_space<vmem>>, vector<8x64xf32>
    %9 = vector.extract_strided_slice %8 {offsets = [0, 0], sizes = [1, 32], strides = [1, 1]} : vector<8x64xf32> to vector<1x32xf32>
    %10 = vector.extract_strided_slice %8 {offsets = [1, 0], sizes = [1, 32], strides = [1, 1]} : vector<8x64xf32> to vector<1x32xf32>
    %11 = vector.extract_strided_slice %8 {offsets = [2, 0], sizes = [1, 32], strides = [1, 1]} : vector<8x64xf32> to vector<1x32xf32>
    %12 = vector.extract_strided_slice %8 {offsets = [3, 0], sizes = [1, 64], strides = [1, 1]} : vector<8x64xf32> to vector<1x64xf32>
    %13 = vector.extract_strided_slice %8 {offsets = [4, 0], sizes = [1, 64], strides = [1, 1]} : vector<8x64xf32> to vector<1x64xf32>
    %14 = vector.extract_strided_slice %8 {offsets = [5, 0], sizes = [1, 64], strides = [1, 1]} : vector<8x64xf32> to vector<1x64xf32>
    %15 = vector.extract_strided_slice %8 {offsets = [6, 0], sizes = [1, 1], strides = [1, 1]} : vector<8x64xf32> to vector<1x1xf32>
    %16 = vector.shape_cast %0 : vector<2x16x58xbf16> to vector<32x58xbf16>
    %cst = arith.constant dense<0.000000e+00> : vector<32x64xf32>
    %17 = tpu.matmul %16, %3, %cst {dimension_numbers = #tpu.dot_dimension_numbers<[1], [0], [0], [1], [0, 0, 1, 1], [], []>} : vector<32x58xbf16>, vector<58x64xbf16>, vector<32x64xf32> -> vector<32x64xf32>
    %18 = vector.extract_strided_slice %17 {offsets = [0, 0], sizes = [32, 32], strides = [1, 1]} : vector<32x64xf32> to vector<32x32xf32>
    %19 = vector.shape_cast %18 : vector<32x32xf32> to vector<2x16x32xf32>
    %20 = vector.extract_strided_slice %17 {offsets = [0, 32], sizes = [32, 32], strides = [1, 1]} : vector<32x64xf32> to vector<32x32xf32>
    %21 = vector.shape_cast %20 : vector<32x32xf32> to vector<2x16x32xf32>
    %22 = arith.truncf %19 : vector<2x16x32xf32> to vector<2x16x32xbf16>
    "tpu.trace_start"() <{level = 10 : i32, message = "bij,bjk->bik"}> : () -> ()
    %cst_9 = arith.constant dense<0.000000e+00> : vector<2x16x32xf32>
    %23 = tpu.matmul %1, %22, %cst_9 {dimension_numbers = #tpu.dot_dimension_numbers<[2], [1], [1], [2], [0, 0, 0, 1, 1, 2], [0], [0]>} : vector<2x16x16xbf16>, vector<2x16x32xbf16>, vector<2x16x32xf32> -> vector<2x16x32xf32>
    "tpu.trace_stop"() : () -> ()
    %24 = arith.addf %23, %21 : vector<2x16x32xf32>
    %25 = vector.shape_cast %9 : vector<1x32xf32> to vector<1x1x32xf32>
    %26 = vector.broadcast %25 : vector<1x1x32xf32> to vector<2x16x32xf32>
    %27 = arith.addf %24, %26 : vector<2x16x32xf32>
    %cst_10 = arith.constant 0.000000e+00 : f32
    %28 = vector.broadcast %cst_10 : f32 to vector<2x16x32xf32>
    %29 = arith.maximumf %27, %28 : vector<2x16x32xf32>
    %cst_11 = arith.constant 2.000000e+00 : f32
    %30 = vector.broadcast %cst_11 : f32 to vector<2x16x32xf32>
    %31 = arith.mulf %30, %29 : vector<2x16x32xf32>
    %32 = vector.shape_cast %10 : vector<1x32xf32> to vector<1x1x32xf32>
    %33 = vector.broadcast %32 : vector<1x1x32xf32> to vector<2x16x32xf32>
    %34 = arith.addf %31, %33 : vector<2x16x32xf32>
    %cst_12 = arith.constant 0.000000e+00 : f32
    %35 = vector.broadcast %cst_12 : f32 to vector<2x16x32xf32>
    %36 = arith.maximumf %34, %35 : vector<2x16x32xf32>
    %cst_13 = arith.constant 2.000000e+00 : f32
    %37 = vector.broadcast %cst_13 : f32 to vector<2x16x32xf32>
    %38 = arith.mulf %37, %36 : vector<2x16x32xf32>
    %39 = vector.shape_cast %11 : vector<1x32xf32> to vector<1x1x32xf32>
    %40 = vector.broadcast %39 : vector<1x1x32xf32> to vector<2x16x32xf32>
    %41 = arith.addf %38, %40 : vector<2x16x32xf32>
    %cst_14 = arith.constant 0.000000e+00 : f32
    %42 = vector.broadcast %cst_14 : f32 to vector<2x16x32xf32>
    %43 = arith.maximumf %41, %42 : vector<2x16x32xf32>
    %44 = arith.truncf %43 : vector<2x16x32xf32> to vector<2x16x32xbf16>
    %45 = vector.shape_cast %44 : vector<2x16x32xbf16> to vector<32x32xbf16>
    %cst_15 = arith.constant dense<0.000000e+00> : vector<32x64xf32>
    %46 = tpu.matmul %45, %4, %cst_15 {dimension_numbers = #tpu.dot_dimension_numbers<[1], [0], [0], [1], [0, 0, 1, 1], [], []>} : vector<32x32xbf16>, vector<32x64xbf16>, vector<32x64xf32> -> vector<32x64xf32>
    %47 = vector.broadcast %12 : vector<1x64xf32> to vector<32x64xf32>
    %48 = arith.addf %46, %47 : vector<32x64xf32>
    %cst_16 = arith.constant 0.000000e+00 : f32
    %49 = vector.broadcast %cst_16 : f32 to vector<32x64xf32>
    %50 = arith.maximumf %48, %49 : vector<32x64xf32>
    %51 = vector.shape_cast %50 : vector<32x64xf32> to vector<2x16x64xf32>
    %cst_17 = arith.constant dense<0.000000e+00> : vector<2x64xf32>
    %52 = vector.multi_reduction <add>, %51, %cst_17 [1] : vector<2x16x64xf32> to vector<2x64xf32>
    %53 = arith.negf %52 : vector<2x64xf32>
    %54 = math.exp %53 : vector<2x64xf32>
    %cst_18 = arith.constant 1.000000e+00 : f32
    %55 = vector.broadcast %cst_18 : f32 to vector<2x64xf32>
    %56 = arith.addf %55, %54 : vector<2x64xf32>
    %57 = arith.divf %55, %56 : vector<2x64xf32>
    %58 = arith.truncf %57 : vector<2x64xf32> to vector<2x64xbf16>
    %cst_19 = arith.constant dense<0.000000e+00> : vector<2x64xf32>
    %59 = tpu.matmul %58, %5, %cst_19 {dimension_numbers = #tpu.dot_dimension_numbers<[1], [0], [0], [1], [0, 0, 1, 1], [], []>} : vector<2x64xbf16>, vector<64x64xbf16>, vector<2x64xf32> -> vector<2x64xf32>
    %60 = vector.broadcast %13 : vector<1x64xf32> to vector<2x64xf32>
    %61 = arith.addf %59, %60 : vector<2x64xf32>
    %cst_20 = arith.constant 0.000000e+00 : f32
    %62 = vector.broadcast %cst_20 : f32 to vector<2x64xf32>
    %63 = arith.maximumf %61, %62 : vector<2x64xf32>
    %64 = arith.truncf %63 : vector<2x64xf32> to vector<2x64xbf16>
    %cst_21 = arith.constant dense<0.000000e+00> : vector<2x64xf32>
    %65 = tpu.matmul %64, %6, %cst_21 {dimension_numbers = #tpu.dot_dimension_numbers<[1], [0], [0], [1], [0, 0, 1, 1], [], []>} : vector<2x64xbf16>, vector<64x64xbf16>, vector<2x64xf32> -> vector<2x64xf32>
    %66 = vector.broadcast %14 : vector<1x64xf32> to vector<2x64xf32>
    %67 = arith.addf %65, %66 : vector<2x64xf32>
    %cst_22 = arith.constant 0.000000e+00 : f32
    %68 = vector.broadcast %cst_22 : f32 to vector<2x64xf32>
    %69 = arith.maximumf %67, %68 : vector<2x64xf32>
    %70 = arith.extf %7 : vector<1x64xbf16> to vector<1x64xf32>
    %71 = vector.broadcast %70 : vector<1x64xf32> to vector<2x64xf32>
    %72 = arith.mulf %69, %71 : vector<2x64xf32>
    %cst_23 = arith.constant dense<0.000000e+00> : vector<2xf32>
    %73 = vector.multi_reduction <add>, %72, %cst_23 [1] : vector<2x64xf32> to vector<2xf32>
    %74 = vector.shape_cast %73 : vector<2xf32> to vector<2x1xf32>
    %75 = vector.broadcast %15 : vector<1x1xf32> to vector<2x1xf32>
    %76 = arith.addf %74, %75 : vector<2x1xf32>
    %77 = vector.shape_cast %76 : vector<2x1xf32> to vector<2x1x1xf32>
    %c0_24 = arith.constant 0 : index
    %c0_25 = arith.constant 0 : index
    %c0_26 = arith.constant 0 : index
    %78 = vector.load %arg5[%c0_24, %c0_25, %c0_26] : memref<2x1x1xf32, #tpu.memory_space<vmem>>, vector<2x1x1xf32>
    tpu.vector_store %arg5[%c0_24, %c0_25, %c0_26], %77 {strides = array<i32>} : memref<2x1x1xf32, #tpu.memory_space<vmem>>, vector<2x1x1xf32>,
    return
  }
  func.func @transform_0(%arg0: i32) -> (i32, i32, i32) {
    %c0_i32 = arith.constant 0 : i32
    %c0_i32_0 = arith.constant 0 : i32
    %c0_i32_1 = arith.constant 0 : i32
    return %arg0, %c0_i32, %c0_i32_0 : i32, i32, i32
  }
  func.func @transform_1(%arg0: i32) -> (i32, i32, i32) {
    %c0_i32 = arith.constant 0 : i32
    %c0_i32_0 = arith.constant 0 : i32
    %c0_i32_1 = arith.constant 0 : i32
    return %arg0, %c0_i32, %c0_i32_0 : i32, i32, i32
  }
  func.func @transform_2(%arg0: i32) -> (i32, i32) {
    %c0_i32 = arith.constant 0 : i32
    %c0_i32_0 = arith.constant 0 : i32
    %c0_i32_1 = arith.constant 0 : i32
    return %c0_i32, %c0_i32_0 : i32, i32
  }
  func.func @transform_3(%arg0: i32) -> (i32, i32) {
    %c0_i32 = arith.constant 0 : i32
    %c0_i32_0 = arith.constant 0 : i32
    %c0_i32_1 = arith.constant 0 : i32
    return %c0_i32, %c0_i32_0 : i32, i32
  }
  func.func @transform_4(%arg0: i32) -> (i32, i32, i32) {
    %c0_i32 = arith.constant 0 : i32
    %c0_i32_0 = arith.constant 0 : i32
    %c0_i32_1 = arith.constant 0 : i32
    return %arg0, %c0_i32, %c0_i32_0 : i32, i32, i32
  }
}

</mosaic_0001>

<bundles_post_ra>
// kernel: tpu_custom_call.1
= control target key start
LH: loop header
LB: loop body
LE: loop exit
PB: predicated region body
PF: predicated region fallthrough
CT: control target
= control target key end

     0   :  { %s1088_s15 = smov 0   ;;  %s1211_s0 = inlined_call_operand.vmem [shape: bf16[4,16,58], index: 0, kind: input, shape index: {}]   ;;  %s1212_s1 = inlined_call_operand.vmem [shape: bf16[4,16,16], index: 1, kind: input, shape index: {}]   ;;  %s1213_s2 = inlined_call_operand.vmem [shape: bf16[232,64], index: 2, kind: input, shape index: {}]   ;;  %s1214_s3 = inlined_call_operand.vmem [shape: f32[8,64], index: 3, kind: input, shape index: {}]   ;;  %s1215_s4 = inlined_call_operand.vmem [shape: f32[4,1,1], index: 4, kind: output, shape index: {}]  }
   0x1 LB: > { %s888_s16 = sadd.s32 4294967295, %s1057_s15   ;;  %p892_p0 = scmp.ge.s32.totalorder %s1057_s15, 1  ;;  %s1057_s15 = sphi %s1088_s15, %s14_s15  }
   0x2   : > { %p176_p1 = scmp.lt.s32.totalorder %s1057_s15, 3 }
   0x4   : > { %p177_p2 = pnand %p892_p0, %p176_p1 }
   0x5   : > { %v1025_v0 = vld [vmem:[%s1213_s2] sm:$0xff] (!%p177_p2)   ;;  %v1026_v1 = vld [vmem:[%s1213_s2 + $0x8] sm:$0xff] (!%p177_p2)   ;;  %s893_s21 = sshll.u32 (!%p177_p2), %s888_s16, 1  ;;  %v1027_v2 = vld [vmem:[%s1213_s2 + $0x10] sm:$0xff] (!%p177_p2)   ;;  %vm306_vm0 = vcmask (!%p177_p2), 1044480   ;;  %vm299_vm1 = vcmask (!%p177_p2), 474112   ;;  %v476_v18 = vlaneseq (!%p177_p2) }
   0x6   : > { %180 = sbr.rel (%p177_p2) target bundleno = 1339 (0x53b), region = 36  ;;  %956 = vmatprep.subr.bf16.mxu0 (!%p177_p2), %v1025_v0  ;;  %p209_p3 = scmp.lt.s32.totalorder (!%p177_p2), %s893_s21, 3  ;;  %v1028_v3 = vld [vmem:[%s1213_s2 + $0x18] sm:$0xff] (!%p177_p2)   ;;  %v1059_v7 = vmov (!%p177_p2), 0.0   ;;  %vm1060_vm2 = vmmov (!%p177_p2), 0   ;;  %vm374_vm3 = vcmask (!%p177_p2), 130048  }
   0x7   : > { %957 = vmatpush3.bf16.msra.mxu0 (!%p177_p2), %v1025_v0  ;;  %v308_v5 = vsel (!%p177_p2), %vm306_vm0, %v1028_v3, 0  ;;  %968 = vmatprep.subr.bf16.mxu1 (!%p177_p2), %v1059_v7  ;;  %s1061_s7 = smov (!%p177_p2), 96   ;;  %v1033_v16 = vld [vmem:[%s1213_s2 + $0x20] sm:$0xff] (!%p177_p2)   ;;  %v1034_v17 = vld [vmem:[%s1213_s2 + $0x28] sm:$0xff] (!%p177_p2)   ;;  %v1137_v19 = vshrl.u32 (!%p177_p2), %v476_v18, 7  ;;  %vm538_vm4 = vcmask (!%p177_p2), 261120  }
   0x8   : > { %958 = vmatprep.subr.bf16.mxu0 (!%p177_p2), %v1026_v1  ;;  %970 = vmatprep.mubr.msk.bf16.mxu1 (!%p177_p2), %vm1060_vm2, %v1059_v7  ;;  %v1143_v22 = vld [vmem:[%s1214_s3] sm:$0xff] (!%p177_p2)  ;;  %v1039_v18 = vld [vmem:[%s1213_s2 + $0x50] sm:$0xff] (!%p177_p2)   ;;  %vm598_vm5 = vcmask (!%p177_p2), 523264   ;;  %vm639_vm6 = vcmask (!%p177_p2), 1041409   ;;  %vm789_vm7 = vcmask (!%p177_p2), 517120   ;;  %vm823_vm8 = vcmask (!%p177_p2), 0  }
   0x9   : > { %v478_v20 = vsub.s32 (!%p177_p2), 0, %v1137_v19  ;;  %v494_v26 = vsub.s32 (!%p177_p2), 1, %v1137_v19  ;;  %v510_v37 = vsub.s32 (!%p177_p2), 2, %v1137_v19 }
   0xb   : > { %959 = vmatpush3.bf16.msra.mxu0 (!%p177_p2), %v1026_v1  ;;  %v479_v23 = vrot.slane (!%p177_p2), %v1143_v22, %v478_v20  ;;  %v495_v35 = vrot.slane (!%p177_p2), %v1143_v22, %v494_v26  ;;  %v511_v46 = vrot.slane (!%p177_p2), %v1143_v22, %v510_v37 }
   0xc   : > { %960 = vmatprep.subr.bf16.mxu0 (!%p177_p2), %v1027_v2 }
   0xd   : > { %s1217_s21 = smov (!%p209_p3, %s893_s21), 3 }
   0xe   : > { %s930_s26 = sshll.u32 %s1217_s21, 3  ;;  %s225_s10 = scalar_lea.vmem %s1215_s4, %s1217_s21 }
   0xf   : > { %s213_s29 = scalar_lea.vmem %s1211_s0, %s930_s26  ;;  %s1117_s6 = scalar_lea.vmem %s1212_s1, %s930_s26  ;;  %961 = vmatpush3.bf16.msra.mxu0 %v1027_v2 }
  0x10   : > { %v1029_v4 = vld [vmem:[%s213_s29] sm:$0xff]   ;;  %1012 = vmatprep.subr.msk.bf16.mxu0 %vm306_vm0, %v1028_v3  ;;  %v1030_v6 = vld [vmem:[%s213_s29 + $0x8] sm:$0xff]  }
  0x11   : > { %964 = vmatprep.mubr.msk.bf16.mxu0 %vm299_vm1, %v1029_v4  ;;  %v1031_v14 = vld [vmem:[%s1117_s6] sm:$0xff]   ;;  %v1032_v15 = vld [vmem:[%s1117_s6 + $0x8] sm:$0xff]  }
  0x13   : > { %963 = vmatpush3.bf16.msra.mxu0 %v308_v5 }
  0x14   : > { %988 = vmatprep.subr.bf16.mxu0 %v1059_v7 }
  0x16   : > { %965 = vmatmul.mubr.msk.bf16.vlgmr.msra.gmra.mrb[0].mxu0 %vm299_vm1, %v1030_v6 }
  0x17   : > { %996 = vmatprep.mubr.msk.bf16.mxu0 %vm1060_vm2, %v1059_v7 }
  0xe9   : > { %v966_v8 = vpop.f32.mrb[0].mxu0 }
  0xea   : > { %426 = vrot.lane.b32.xlu1 %v966_v8, %s1061_s7  ;;  %v344_v9 = vpop.f32.mrb[1].mxu0 }
  0xeb   : > { %368 = vrot.lane.b32.xlu0 %v344_v9, %s1061_s7  ;;  %v967_v10 = vpop.f32.mrb[2].mxu0 }
  0xec   : > { %v360_v11 = vpack.c.bf16 %v967_v10, %v966_v8  ;;  %v347_v12 = vpop.f32.mrb[3].mxu0 }
  0xed   : > { %v359_v13 = vpack.c.bf16 %v347_v12, %v344_v9 }
  0xee   : > { %428 = vrot.lane.b32.xlu1 %v967_v10, %s1061_s7 }
  0xef   : > { %370 = vrot.lane.b32.xlu0 %v347_v12, %s1061_s7  ;;  %969 = vmatpush3.bf16.msra.mxu1 %v359_v13 }
  0xf0   : > { %974 = vmatprep.subr.bf16.mxu1 %v1059_v7 }
  0xf2   : > { %971 = vmatmul.mubr.msk.bf16.vlgmr.msra.gmra.mrb[0].mxu1 %vm374_vm3, %v1031_v14  ;;  %v1035_v14 = vld [vmem:[%s1213_s2 + $0x30] sm:$0xff]  }
  0xf3   : > { %975 = vmatpush3.bf16.msra.mxu1 %v360_v11  ;;  %976 = vmatprep.mubr.msk.bf16.mxu1 %vm1060_vm2, %v1059_v7 }
  0xf4   : > { %980 = vmatprep.subr.bf16.mxu1 %v1033_v16  ;;  %989 = vmatpush3.bf16.msra.mxu0 %v1035_v14 }
  0xf5   : > { %990 = vmatprep.subr.bf16.mxu0 %v1059_v7 }
  0xfa   : > { %977 = vmatmul.mubr.msk.bf16.vlgmr.msra.gmra.mrb[4].mxu1 %vm374_vm3, %v1032_v15  ;;  %v1036_v15 = vld [vmem:[%s1213_s2 + $0x38] sm:$0xff]  }
  0xfb   : > { %981 = vmatpush3.bf16.msra.mxu1 %v1033_v16  ;;  %991 = vmatpush3.bf16.msra.mxu0 %v1036_v15  ;;  %v1037_v16 = vld [vmem:[%s1213_s2 + $0x40] sm:$0xff]  }
  0xfc   : > { %982 = vmatprep.subr.bf16.mxu1 %v1034_v17  ;;  %992 = vmatprep.subr.bf16.mxu0 %v1059_v7 }
  0xff   : > { %983 = vmatpush3.bf16.msra.mxu1 %v1034_v17  ;;  %993 = vmatpush3.bf16.msra.mxu0 %v1037_v16  ;;  %v1038_v17 = vld [vmem:[%s1213_s2 + $0x48] sm:$0xff]  }
 0x100   : > { %1000 = vmatprep.subr.bf16.mxu1 %v1059_v7  ;;  %994 = vmatprep.subr.bf16.mxu0 %v1059_v7 }
 0x103   : > { %995 = vmatpush3.bf16.msra.mxu0 %v1038_v17  ;;  %v264_v17 = vld [vmem:[%s1213_s2 + $0x70] sm:$0xf] }
 0x15c   : > { %v427_v33 = vpop.permute.xlu1 %426 }
 0x15d   : > { %v369_v21 = vpop.permute.xlu0 %368 }
 0x160   : > { %v429_v45 = vpop.permute.xlu1 %428 }
 0x161   : > { %v371_v28 = vpop.permute.xlu0 %370 }
 0x1c5   : > { %v412_v24 = vpop.f32.mrb[0].mxu1 }
 0x1c6   : > { %v413_v25 = vadd.f32 %v412_v24, %v369_v21  ;;  %v972_v27 = vpop.f32.mrb[1].mxu1  ;;  %v1040_v21 = vld [vmem:[%s1213_s2 + $0x58] sm:$0xff]  }
 0x1c7   : > { %v415_v29 = vpop.f32.mrb[2].mxu1 }
 0x1c8   : > { %v480_v30 = vadd.f32 %v479_v23, %v413_v25  ;;  %v416_v31 = vadd.f32 %v415_v29, %v371_v28  ;;  %v973_v32 = vpop.f32.mrb[3].mxu1 }
 0x1ca   : > { %v484_v34 = vmax.f32 %v480_v30, 0.0  ;;  %v481_v36 = vadd.f32 %v479_v23, %v416_v31 }
 0x1cc   : > { %v488_v38 = vmul.f32 2.0, %v484_v34  ;;  %v485_v39 = vmax.f32 %v481_v36, 0.0 }
 0x1cd   : > { %v469_v40 = vpop.f32.mrb[4].mxu1 }
 0x1ce   : > { %v496_v41 = vadd.f32 %v495_v35, %v488_v38  ;;  %v489_v42 = vmul.f32 2.0, %v485_v39  ;;  %v470_v43 = vadd.f32 %v469_v40, %v427_v33  ;;  %v978_v44 = vpop.f32.mrb[5].mxu1 }
 0x1cf   : > { %v472_v47 = vpop.f32.mrb[6].mxu1 }
 0x1d0   : > { %v500_v48 = vmax.f32 %v496_v41, 0.0  ;;  %v497_v49 = vadd.f32 %v495_v35, %v489_v42  ;;  %v482_v50 = vadd.f32 %v479_v23, %v470_v43  ;;  %v473_v51 = vadd.f32 %v472_v47, %v429_v45  ;;  %v979_v52 = vpop.f32.mrb[7].mxu1 }
 0x1d2   : > { %v504_v53 = vmul.f32 2.0, %v500_v48  ;;  %v501_v54 = vmax.f32 %v497_v49, 0.0  ;;  %v486_v55 = vmax.f32 %v482_v50, 0.0  ;;  %v483_v56 = vadd.f32 %v479_v23, %v473_v51 }
 0x1d3   : > { %v524_v23 = vsub.s32 3, %v1137_v19 }
 0x1d4   : > { %v512_v57 = vadd.f32 %v511_v46, %v504_v53  ;;  %v505_v58 = vmul.f32 2.0, %v501_v54  ;;  %v490_v59 = vmul.f32 2.0, %v486_v55  ;;  %v487_v60 = vmax.f32 %v483_v56, 0.0 }
 0x1d5   : > { %v525_v24 = vrot.slane %v1143_v22, %v524_v23 }
 0x1d6   : > { %v513_v61 = vadd.f32 %v511_v46, %v505_v58  ;;  %v498_v62 = vadd.f32 %v495_v35, %v490_v59  ;;  %v491_v63 = vmul.f32 2.0, %v487_v60  ;;  %v516_v0 = vmax.f32 %v512_v57, 0.0 }
 0x1d8   : > { %v517_v1 = vmax.f32 %v513_v61, 0.0  ;;  %v502_v2 = vmax.f32 %v498_v62, 0.0  ;;  %v499_v3 = vadd.f32 %v495_v35, %v491_v63 }
 0x1da   : > { %v506_v4 = vmul.f32 2.0, %v502_v2  ;;  %v503_v5 = vmax.f32 %v499_v3, 0.0  ;;  %v520_v6 = vpack.c.bf16 %v517_v1, %v516_v0 }
 0x1dc   : > { %v514_v8 = vadd.f32 %v511_v46, %v506_v4  ;;  %v507_v9 = vmul.f32 2.0, %v503_v5  ;;  %984 = vmatprep.mubr.msk.bf16.mxu1 %vm538_vm4, %v520_v6  ;;  %v1041_v5 = vld [vmem:[%s1213_s2 + $0x60] sm:$0xff]   ;;  %v1042_v6 = vld [vmem:[%s1213_s2 + $0x68] sm:$0xff]  }
 0x1de   : > { %v515_v10 = vadd.f32 %v511_v46, %v507_v9  ;;  %v518_v11 = vmax.f32 %v514_v8, 0.0  ;;  %v633_v8 = vsub.s32 4, %v1137_v19 }
 0x1e0   : > { %v519_v12 = vmax.f32 %v515_v10, 0.0  ;;  %v634_v9 = vrot.slane %v1143_v22, %v633_v8 }
 0x1e2   : > { %v521_v13 = vpack.c.bf16 %v519_v12, %v518_v11 }
 0x1e4   : > { %985 = vmatmul.mubr.msk.bf16.vlgmr.msra.gmra.mrb[8].mxu1 %vm538_vm4, %v521_v13 }
 0x1e5   : > { %1008 = vmatprep.mubr.msk.bf16.mxu1 %vm1060_vm2, %v1059_v7  ;;  %1001 = vmatpush3.bf16.msra.mxu1 %v1039_v18 }
 0x1e6   : > { %1002 = vmatprep.subr.bf16.mxu1 %v1059_v7 }
 0x1e9   : > { %1003 = vmatpush3.bf16.msra.mxu1 %v1040_v21  ;;  %v783_v21 = vunpack.c.l.bf16 %v264_v17 }
 0x1ea   : > { %1004 = vmatprep.subr.bf16.mxu1 %v1059_v7 }
 0x1ed   : > { %1005 = vmatpush3.bf16.msra.mxu1 %v1041_v5 }
 0x1ee   : > { %1006 = vmatprep.subr.bf16.mxu1 %v1059_v7  ;;  %v713_v7 = vsub.s32 5, %v1137_v19 }
 0x1f0   : > { %v714_v18 = vrot.slane %v1143_v22, %v713_v7 }
 0x1f1   : > { %1007 = vmatpush3.bf16.msra.mxu1 %v1042_v6 }
 0x2b7   : > { %v986_v25 = vpop.f32.mrb[8].mxu1 }
 0x2b8   : > { %v588_v26 = vadd.f32 %v986_v25, %v525_v24  ;;  %v579_v27 = vpop.f32.mrb[9].mxu1 }
 0x2b9   : > { %v580_v28 = vadd.f32 %v579_v27, %v525_v24  ;;  %v987_v29 = vpop.f32.mrb[10].mxu1 }
 0x2ba   : > { %v596_v30 = vmax.f32 %v588_v26, 0.0  ;;  %v591_v31 = vadd.f32 %v987_v29, %v525_v24  ;;  %v582_v32 = vpop.f32.mrb[11].mxu1  ;;  %v787_v26 = vrot.slane %v783_v21, %v478_v20 }
 0x2bb   : > { %v594_v33 = vmax.f32 %v580_v28, 0.0  ;;  %v583_v34 = vadd.f32 %v582_v32, %v525_v24  ;;  %v1062_v32 = vmov 1966171168  }
 0x2bc   : > { %v597_v35 = vmax.f32 %v591_v31, 0.0  ;;  %v608_v37 = vsel %vm598_vm5, %v596_v30, 0.0 }
 0x2bd   : > { %v595_v36 = vmax.f32 %v583_v34, 0.0  ;;  %v599_v39 = vsel %vm598_vm5, %v594_v33, 0.0  ;;  %v800_v33 = vunpack.c.l.s4 %v1062_v32  ;;  %v795_v34 = vsub.s32 6, %v1137_v19 }
 0x2be   : > { %v609_v38 = vsel %vm598_vm5, %v597_v35, 0.0 }
 0x2bf   : > { %v610_v40 = vadd.f32 %v609_v38, %v608_v37  ;;  %v600_v41 = vsel %vm598_vm5, %v595_v36, 0.0  ;;  %v801_v35 = vunpack.c.0.s8 %v800_v33  ;;  %v796_v36 = vrot.slane %v1143_v22, %v795_v34 }
 0x2c0   : > { %v601_v42 = vadd.f32 %v600_v41, %v599_v39 }
 0x2c1   : > { %v611_v43 = vrot.slane %v610_v40, 4  ;;  %v804_v37 = vsub.s32 %v801_v35, %v1137_v19 }
 0x2c2   : > { %v602_v44 = vrot.slane %v601_v42, 4 }
 0x2c3   : > { %v612_v45 = vadd.f32 %v611_v43, %v610_v40 }
 0x2c4   : > { %v603_v46 = vadd.f32 %v602_v44, %v601_v42 }
 0x2c5   : > { %v613_v47 = vrot.slane %v612_v45, 2 }
 0x2c6   : > { %v604_v48 = vrot.slane %v603_v46, 2 }
 0x2c7   : > { %v614_v49 = vadd.f32 %v613_v47, %v612_v45 }
 0x2c8   : > { %v605_v50 = vadd.f32 %v604_v48, %v603_v46 }
 0x2c9   : > { %v615_v51 = vrot.slane %v614_v49, 1 }
 0x2ca   : > { %v606_v52 = vrot.slane %v605_v50, 1 }
 0x2cb   : > { %v616_v53 = vadd.f32 %v615_v51, %v614_v49 }
 0x2cc   : > { %v607_v54 = vadd.f32 %v606_v52, %v605_v50 }
 0x2cd   : > { %v917_v55 = vmul.f32 -1.442695, %v616_v53 }
 0x2ce   : > { %v916_v56 = vmul.f32 -1.442695, %v607_v54 }
 0x2cf   : > { %1043 = vpow2.f32 %v917_v55 }
 0x2d0   : > { %1045 = vpow2.f32 %v916_v56 }
 0x2d9   : > { %v1044_v57 = vpop.eup %1043 }
 0x2da   : > { %v1046_v58 = vpop.eup %1045  ;;  %v624_v59 = vadd.f32 1.0, %v1044_v57 }
 0x2db   : > { %v623_v60 = vadd.f32 1.0, %v1046_v58 }
 0x2dc   : > { %1047 = vrcp.f32 %v624_v59 }
 0x2dd   : > { %1049 = vrcp.f32 %v623_v60 }
 0x2e6   : > { %v1048_v61 = vpop.eup %1047 }
 0x2e7   : > { %v1050_v62 = vpop.eup %1049  ;;  %v630_v63 = vpack.c.bf16 %v1048_v61, %v1048_v61 }
 0x2e8   : > { %v629_v0 = vpack.c.bf16 %v1050_v62, %v1050_v62 }
 0x2e9   : > { %v638_v1 = vunpack.c.l.b16 %v630_v63 }
 0x2ea   : > { %v637_v2 = vunpack.c.l.b16 %v629_v0 }
 0x2ec   : > { %v640_v3 = vsel %vm639_vm6, %v638_v1, %v637_v2 }
 0x2ed   : > { %v641_v4 = vpack.c.b16 %v640_v3, %v640_v3 }
 0x2ef   : > { %997 = vmatmul.mubr.msk.bf16.vlgmr.msra.gmra.mrb[4].mxu0 %vm598_vm5, %v641_v4 }
 0x3c2   : > { %v703_v10 = vpop.f32.mrb[4].mxu0 }
 0x3c3   : > { %v704_v11 = vadd.f32 %v703_v10, %v634_v9  ;;  %v998_v12 = vpop.f32.mrb[5].mxu0 }
 0x3c4   : > { %v706_v13 = vpop.f32.mrb[6].mxu0 }
 0x3c5   : > { %v709_v14 = vmax.f32 %v704_v11, 0.0  ;;  %v999_v15 = vpop.f32.mrb[7].mxu0 }
 0x3c7   : > { %v710_v16 = vpack.c.bf16 %v709_v14, %v709_v14 }
 0x3c9   : > { %1009 = vmatmul.mubr.msk.bf16.vlgmr.msra.gmra.mrb[12].mxu1 %vm598_vm5, %v710_v16 }
 0x49c   : > { %v776_v23 = vpop.f32.mrb[12].mxu1 }
 0x49d   : > { %v777_v24 = vadd.f32 %v776_v23, %v714_v18  ;;  %v1010_v25 = vpop.f32.mrb[13].mxu1 }
 0x49e   : > { %v779_v27 = vpop.f32.mrb[14].mxu1 }
 0x49f   : > { %v782_v28 = vmax.f32 %v777_v24, 0.0  ;;  %v1011_v29 = vpop.f32.mrb[15].mxu1 }
 0x4a1   : > { %v788_v30 = vmul.f32 %v787_v26, %v782_v28 }
 0x4a3   : > { %v790_v31 = vsel %vm789_vm7, %v788_v30, 0.0 }
 0x4a4   : > { %791 = vadd.xlane.f32.xlu0 %v790_v31 }
 0x531   : > { %v792_v38 = vpop.xlane.xlu0 %791 }
 0x532   : > { %v797_v39 = vadd.f32 %v796_v36, %v792_v38 }
 0x534   : > { %v805_v20 = vrot.slane %v797_v39, %v804_v37 }
 0x536   : > { %v806_v40 = vcombine.high %v805_v20, %v805_v20  ;;  %v813_v41 = vrot.slane %v805_v20, %v804_v37 }
 0x538   : > { %v820_v42 = vrot.slane %v806_v40, %v804_v37  ;;  %824 = vst.msk [vmem:[%s225_s10] sm:$0x1] %vm823_vm8, %v813_v41 }
 0x53a   : > { %825 = vst.msk [vmem:[%s225_s10 + $0x1] sm:$0x1] %vm823_vm8, %v820_v42 }
 0x53b PF: > { %s14_s15 = sadd.s32 1, %s1057_s15  }
 0x53c   : > { %p11_p4 = scmp.ge.s32.totalorder %s14_s15, 4  }
 0x53e   :  { %13 = sbr.rel (!%p11_p4) target bundleno = 1 (0x1), region = 69 }

</bundles_post_ra>
